<compile_context>
chip_gen: v7x
topology: tpu7x:2x2x1
jax: 0.10.0
libtpu: 0.0.40
codegen_flags: <defaults>
</compile_context>

<pallas_src>
import jax
import jax.numpy as jnp
from jax.experimental import pallas as pl
from jax.experimental.pallas import tpu as pltpu

GAMMA = 2.0
LANES = 128
NCORES = 2                  # leading "parallel" grid axis (megacore on v7x)
DEFAULT_TILE_ROWS = 2048    # (2048,128) f32 = 1 MiB/buffer; 4 MiB double-buffered


def _cdiv(a, b):
    return (a + b - 1) // b


def _round_up(x, m):
    return _cdiv(x, m) * m


def _make_focal_kernel(total_n, tr, steps, need_mask):
    def kernel(x_ref, t_ref, o_ref):
        c = pl.program_id(0)   # parallel (per-core) axis
        j = pl.program_id(1)   # arbitrary (reduction) axis

        @pl.when(j == 0)
        def _():
            o_ref[...] = jnp.zeros_like(o_ref)

        x = x_ref[...].astype(jnp.float32)
        t = t_ref[...].astype(jnp.float32)
        # numerically-stable BCE with logits:
        #   max(x, 0) - x*t + log1p(exp(-|x|))
        bce = jnp.maximum(x, 0.0) - x * t + jnp.log1p(jnp.exp(-jnp.abs(x)))

        if need_mask:
            # zero out the zero-padded tail (statically elided when exact fit)
            row0 = (c * steps + j) * tr
            gidx = (row0 + jax.lax.broadcasted_iota(jnp.int32, (tr, LANES), 0)) * LANES \
                 + jax.lax.broadcasted_iota(jnp.int32, (tr, LANES), 1)
            bce = jnp.where(gidx < total_n, bce, 0.0)

        # Lane-dense accumulation: collapse the tr rows of this tile into an
        # (8,128) vreg-shaped partial (pure VPU adds over the leading dim).
        partial = bce.reshape(tr // 8, 8, LANES).sum(axis=0)
        o_ref[...] += partial[None, :, :]

    return kernel


def focal_loss(inputs, targets, gamma=GAMMA, tile_rows=DEFAULT_TILE_ROWS):
    """inputs, targets: same-shape float arrays (any rank). Returns scalar f32 loss."""
    assert inputs.shape == targets.shape
    total_n = 1
    for d in inputs.shape:
        total_n *= d

    rows = _cdiv(total_n, LANES)
    # rows handled per tile: >= 8 (sublane constraint), <= tile_rows (VMEM budget)
    tr = min(tile_rows, max(8, _round_up(_cdiv(rows, NCORES), 8)))
    steps = _cdiv(rows, NCORES * tr)
    padded_rows = NCORES * steps * tr
    padded_n = padded_rows * LANES
    need_mask = padded_n != total_n

    # Flatten; keep HBM dtype (cast is done in-kernel so bf16 streams at 2 B/elt).
    x_flat = inputs.reshape(-1)
    t_flat = targets.reshape(-1)
    if need_mask:
        pad = padded_n - total_n
        x_flat = jnp.pad(x_flat, (0, pad))
        t_flat = jnp.pad(t_flat, (0, pad))
    x2 = x_flat.reshape(padded_rows, LANES)
    t2 = t_flat.reshape(padded_rows, LANES)

    in_map = lambda c, j: (c * steps + j, 0)

    partials = pl.pallas_call(
        _make_focal_kernel(total_n, tr, steps, need_mask),
        out_shape=jax.ShapeDtypeStruct((NCORES, 8, LANES), jnp.float32),
        grid_spec=pltpu.PrefetchScalarGridSpec(
            num_scalar_prefetch=0,
            grid=(NCORES, steps),
            in_specs=[
                pl.BlockSpec((tr, LANES), in_map),
                pl.BlockSpec((tr, LANES), in_map),
            ],
            out_specs=pl.BlockSpec((1, 8, LANES), lambda c, j: (c, 0, 0)),
        ),
        compiler_params=pltpu.CompilerParams(
            dimension_semantics=("parallel", "arbitrary"),
        ),
    )(x2, t2)

    # Tiny epilogue: combine the per-core lane-dense partials + focal transform.
    ce = jnp.sum(partials) / total_n        # reduction='mean'
    pt = jnp.exp(-ce)
    return (1.0 - pt) ** gamma * ce


def focal_loss_ref(inputs, targets, gamma=GAMMA):
    x = inputs.astype(jnp.float32)
    t = targets.astype(jnp.float32)
    bce = jnp.maximum(x, 0.0) - x * t + jnp.log1p(jnp.exp(-jnp.abs(x)))
    ce = jnp.mean(bce)
    pt = jnp.exp(-ce)
    return (1.0 - pt) ** gamma * ce


if __name__ == "__main__":
    key = jax.random.PRNGKey(0)
    k1, k2 = jax.random.split(key)
    # NCHW logits and probabilistic targets, as BCEWithLogits expects
    B, C, H, W = 2, 4, 16, 16
    logits = jax.random.normal(k1, (B, C, H, W), dtype=jnp.float32)
    targets = jax.random.uniform(k2, (B, C, H, W), dtype=jnp.float32)

    loss = jax.block_until_ready(focal_loss(logits, targets))
    ref = focal_loss_ref(logits, targets)
    assert jnp.allclose(loss, ref, rtol=1e-5, atol=1e-6), (loss, ref)
    print("KERNEL_OK")
</pallas_src>

<mosaic_0001>
module attributes {stable_mosaic.version = 11 : i64} {
  func.func @kernel(%arg0: i32, %arg1: i32, %arg2: memref<8x128xf32, #tpu.memory_space<vmem>>, %arg3: memref<8x128xf32, #tpu.memory_space<vmem>>, %arg4: memref<1x8x128xf32, #tpu.memory_space<vmem>>) attributes {dimension_semantics = [#tpu.dimension_semantics<parallel>, #tpu.dimension_semantics<arbitrary>], iteration_bounds = array<i64: 2, 1>, scalar_prefetch = 0 : i64, scratch_operands = 0 : i64, tpu.core_type = #tpu.core_type<tc>, window_params = [{transform_indices = @transform_0, window_bounds = array<i64: 8, 128>}, {transform_indices = @transform_1, window_bounds = array<i64: 8, 128>}, {transform_indices = @transform_2, window_bounds = array<i64: 1, 8, 128>}]} {
    %c0_i32 = arith.constant 0 : i32
    %0 = arith.cmpi eq, %arg1, %c0_i32 : i32
    %1 = arith.extui %0 : i1 to i32
    %c0_i32_0 = arith.constant 0 : i32
    %2 = arith.cmpi ne, %1, %c0_i32_0 : i32
    scf.if %2 {
      %cst_12 = arith.constant 0.000000e+00 : f32
      %21 = vector.broadcast %cst_12 : f32 to vector<1x8x128xf32>
      %c0_13 = arith.constant 0 : index
      %c0_14 = arith.constant 0 : index
      %c0_15 = arith.constant 0 : index
      %22 = vector.load %arg4[%c0_13, %c0_14, %c0_15] : memref<1x8x128xf32, #tpu.memory_space<vmem>>, vector<1x8x128xf32>
      tpu.vector_store %arg4[%c0_13, %c0_14, %c0_15], %21 {strides = array<i32>} : memref<1x8x128xf32, #tpu.memory_space<vmem>>, vector<1x8x128xf32>,
    } else {
    }
    %c0 = arith.constant 0 : index
    %c0_1 = arith.constant 0 : index
    %3 = vector.load %arg2[%c0, %c0_1] : memref<8x128xf32, #tpu.memory_space<vmem>>, vector<8x128xf32>
    %c0_2 = arith.constant 0 : index
    %c0_3 = arith.constant 0 : index
    %4 = vector.load %arg3[%c0_2, %c0_3] : memref<8x128xf32, #tpu.memory_space<vmem>>, vector<8x128xf32>
    %cst = arith.constant 0.000000e+00 : f32
    %5 = vector.broadcast %cst : f32 to vector<8x128xf32>
    %6 = arith.maximumf %3, %5 : vector<8x128xf32>
    %7 = arith.mulf %3, %4 : vector<8x128xf32>
    %8 = arith.subf %6, %7 : vector<8x128xf32>
    %9 = math.absf %3 : vector<8x128xf32>
    %cst_4 = arith.constant 0.000000e+00 : f32
    %10 = vector.broadcast %cst_4 : f32 to vector<8x128xf32>
    %11 = arith.subf %10, %9 : vector<8x128xf32>
    %12 = math.exp %11 : vector<8x128xf32>
    %13 = math.log1p %12 : vector<8x128xf32>
    %14 = arith.addf %8, %13 : vector<8x128xf32>
    %15 = vector.shape_cast %14 : vector<8x128xf32> to vector<1x8x128xf32>
    %cst_5 = arith.constant dense<0.000000e+00> : vector<8x128xf32>
    %16 = vector.multi_reduction <add>, %15, %cst_5 [0] : vector<1x8x128xf32> to vector<8x128xf32>
    %c0_6 = arith.constant 0 : index
    %c0_7 = arith.constant 0 : index
    %c0_8 = arith.constant 0 : index
    %17 = vector.load %arg4[%c0_6, %c0_7, %c0_8] : memref<1x8x128xf32, #tpu.memory_space<vmem>>, vector<1x8x128xf32>
    %18 = vector.shape_cast %16 : vector<8x128xf32> to vector<1x8x128xf32>
    %19 = arith.addf %17, %18 : vector<1x8x128xf32>
    %c0_9 = arith.constant 0 : index
    %c0_10 = arith.constant 0 : index
    %c0_11 = arith.constant 0 : index
    %20 = vector.load %arg4[%c0_9, %c0_10, %c0_11] : memref<1x8x128xf32, #tpu.memory_space<vmem>>, vector<1x8x128xf32>
    tpu.vector_store %arg4[%c0_9, %c0_10, %c0_11], %19 {strides = array<i32>} : memref<1x8x128xf32, #tpu.memory_space<vmem>>, vector<1x8x128xf32>,
    return
  }
  func.func @transform_0(%arg0: i32, %arg1: i32) -> (i32, i32) {
    %c1_i32 = arith.constant 1 : i32
    %0 = arith.muli %arg0, %c1_i32 : i32
    %1 = arith.addi %0, %arg1 : i32
    %c0_i32 = arith.constant 0 : i32
    %c0_i32_0 = arith.constant 0 : i32
    return %1, %c0_i32 : i32, i32
  }
  func.func @transform_1(%arg0: i32, %arg1: i32) -> (i32, i32) {
    %c1_i32 = arith.constant 1 : i32
    %0 = arith.muli %arg0, %c1_i32 : i32
    %1 = arith.addi %0, %arg1 : i32
    %c0_i32 = arith.constant 0 : i32
    %c0_i32_0 = arith.constant 0 : i32
    return %1, %c0_i32 : i32, i32
  }
  func.func @transform_2(%arg0: i32, %arg1: i32) -> (i32, i32, i32) {
    %c0_i32 = arith.constant 0 : i32
    %c0_i32_0 = arith.constant 0 : i32
    %c0_i32_1 = arith.constant 0 : i32
    return %arg0, %c0_i32, %c0_i32_0 : i32, i32, i32
  }
}

</mosaic_0001>

<bundles_post_ra>
// kernel: tpu_custom_call.1
= control target key start
LH: loop header
LB: loop body
LE: loop exit
PB: predicated region body
PF: predicated region fallthrough
CT: control target
= control target key end

     0   :  { %7 = vsyncpa [#allocation3], 0  ;;  %s840_s0 = inlined_call_operand.hbm [shape: f32[16,128], index: 0, kind: input, shape index: {}]   ;;  %s841_s1 = inlined_call_operand.hbm [shape: f32[16,128], index: 1, kind: input, shape index: {}]   ;;  %s842_s2 = inlined_call_operand.hbm [shape: f32[2,8,128], index: 2, kind: output, shape index: {}]  }
   0x1   :  { %9 = vsyncpa [#allocation3 + $0x1], 0 }
   0x2   :  { %10 = vsyncpa [#allocation6], 0 }
   0x3   :  { %12 = vsyncpa [#allocation6 + $0x1], 0 }
   0x4   :  { %13 = vsyncpa [#allocation4], 0 }
   0x5   :  { %15 = vsyncpa [#allocation4 + $0x1], 0  ;;  %s615_s9 = smov 0   ;;  %s617_s10 = smov 0  }
   0x6   :  { %s619_s11 = smov 0   ;;  %s621_s12 = smov 0  }
   0x7   :  { %s623_s13 = smov 0   ;;  %s625_s14 = smov 0  }
   0x8 LB: > { %s361_s15 = sadd.s32 4294967295, %s595_s14   ;;  %s362_s16 = sadd.s32 4294967294, %s595_s14   ;;  %s595_s14 = sphi %s625_s14, %s21_s14   ;;  %s591_s13 = sphi %s623_s13, %s862_s13   ;;  %s587_s12 = sphi %s621_s12, %s861_s12   ;;  %s583_s11 = sphi %s619_s11, %s860_s11   ;;  %s579_s10 = sphi %s617_s10, %s859_s10   ;;  %s575_s9 = sphi %s615_s9, %s858_s9  }
   0x9   : > { %s33_s17 = sadd.s32 1, %s591_s13  ;;  %s42_s18 = sadd.s32 1, %s583_s11 }
   0xa   : > { %p35_p0 = scmp.ge.s32.totalorder %s33_s17, 2  ;;  %p49_p1 = scmp.ne.s32.totalorder %s583_s11, %s579_s10 }
   0xb   : > { %p50_p2 = scmp.eq.s32.totalorder %s595_s14, 0  ;;  %p55_p3 = scmp.ne.s32.totalorder %s579_s10, %s575_s9 }
   0xc   : > { %s864_s17 = smov (%p35_p0, %s33_s17), 0  ;;  %p56_p5 = scmp.eq.s32.totalorder %s361_s15, 0 }
   0xd   : > { %p656_p4 = por %p50_p2, %p49_p1  ;;  %s39_s20 = ssub.s32 %s591_s13, %s864_s17 }
   0xe   : > { %p107_p6 = scmp.eq.s32.totalorder %s361_s15, 1  ;;  %p40_p7 = scmp.eq.s32.totalorder %s39_s20, 0 }
   0xf   : > { %p662_p8 = por %p56_p5, %p55_p3  ;;  %p113_p10 = scmp.eq.s32.totalorder %s362_s16, 1 }
  0x10   : > { %p666_p9 = por %p107_p6, %p49_p1  ;;  %p394_p13 = scmp.lt.s32.totalorder %s595_s14, 2 }
  0x11   : > { %s846_s21 = scalar_select %p662_p8, 1, 0 }
  0x12   : > { %s847_s22 = scalar_select %p666_p9, 1, 0 }
  0x13   : > { %s671_s23 = scalar_select %p40_p7, %s583_s11, %s42_s18  }
  0x14   : > { %p673_p11 = por %p113_p10, %p55_p3  ;;  %s680_s25 = sand.u32 1, %s583_s11  }
  0x15   : > { %s365_s26 = sshll.u32 %s680_s25, 3  ;;  %s366_s27 = sshll.u32 %s591_s13, 7 }
  0x16   : > { %s848_s24 = scalar_select %p673_p11, 1, 0 }
  0x17   : > { %s689_s30 = scalar_lea.hbm %s840_s0, %s366_s27  ;;  %s137_s3 = scalar_lea.vmem [#allocation2], %s365_s26 }
  0x18   : > { %s145_s4 = sshll.u32 %s137_s3, 4  ;;  %p697_p0 = pnand %p394_p13, %p656_p4  ;;  %s693_s4 = int_to_ptr.vmem [resolvable:$true] %s145_s4 }
  0x19   : > { %s134_s6 = scalar_lea.sflag [#allocation3], %s680_s25  ;;  %s449_s7 = scalar_lea.hbm %s689_s30, 128 }
  0x1a   : > { %p450_p3 = scmp.ne.s32.totalorder %s689_s30, %s449_s7  ;;  %p451_p5 = pneg %p697_p0 }
  0x1b   : > { %s454_s16 = scalar_lea.hbm %s840_s0, 256  ;;  %p455_p4 = scmp.lt.u32.totalorder %s689_s30, %s840_s0 }
  0x1c   : > { %p452_p6 = pnand %p451_p5, %p450_p3  ;;  %p456_p10 = scmp.lt.u32.totalorder %s454_s16, %s449_s7 }
  0x1d   : > { %p458_p12 = scmp.lt.u32.totalorder %s449_s7, %s689_s30 }
  0x1e   : > { %p453_p7 = pneg %p452_p6  ;;  %p457_p13 = por %p456_p10, %p455_p4 }
  0x20   : > { %p459_p1 = por %p458_p12, %p457_p13 }
  0x22   : > { %p460_p2 = pnand %p459_p1, %p453_p7 }
  0x24   : > { %463 = shalt.err (!%p460_p2)
}
  0x25   : > { %s464_s20 = scalar_lea.vmem %s693_s4, 128  ;;  %s597_s28 = smov [#allocation2]  }
  0x26   : > { %p465_p3 = scmp.ne.s32.totalorder %s693_s4, %s464_s20  ;;  %s469_s29 = sshll.u32 %s597_s28, 4  ;;  %s470_s29 = int_to_ptr.vmem [resolvable:$false] %s469_s29 }
  0x27   : > { %s471_s3 = scalar_lea.vmem %s470_s29, 256  ;;  %p472_p9 = scmp.lt.s32.totalorder %s693_s4, %s470_s29 }
  0x28   : > { %p467_p6 = pnand %p465_p3, %p451_p5  ;;  %p473_p4 = scmp.lt.s32.totalorder %s471_s3, %s464_s20 }
  0x2a   : > { %p468_p11 = pneg %p467_p6  ;;  %p474_p10 = por %p473_p4, %p472_p9 }
  0x2c   : > { %p475_p12 = pnand %p474_p10, %p468_p11 }
  0x2e   : > { %478 = shalt.err (!%p475_p12)
}
  0x2f   : > { %386 = dma.hbm_to_vmem [thread:$0]  (!%p697_p0), %s689_s30, 128, %s693_s4, %s134_s6  }
  0x30   : > { %p850_p1 = scmp.lt.s32.totalorder %s595_s14, 3  ;;  %p851_p2 = scmp.ge.s32.totalorder %s595_s14, 1 }
  0x31   : > { %s742_s16 = scalar_lea.hbm %s841_s1, %s366_s27  ;;  %s156_s18 = scalar_lea.vmem [#allocation5], %s365_s26 }
  0x32   : > { %p733_p7 = pnand %p851_p2, %p850_p1  ;;  %s164_s19 = sshll.u32 %s156_s18, 4  ;;  %s165_s19 = int_to_ptr.vmem [resolvable:$true] %s164_s19 }
  0x33   : > { %s153_s30 = scalar_lea.sflag [#allocation6], %s680_s25  ;;  %s479_s4 = scalar_lea.hbm %s742_s16, 128 }
  0x34   : > { %s852_s7 = scalar_select %p733_p7, 1, 0 }
  0x35   : > { %p480_p9 = scmp.ne.s32.totalorder %s742_s16, %s479_s4  ;;  %s484_s27 = scalar_lea.hbm %s841_s1, 256 }
  0x36   : > { %p485_p3 = scmp.lt.u32.totalorder %s742_s16, %s841_s1  ;;  %p486_p6 = scmp.lt.u32.totalorder %s484_s27, %s479_s4 }
  0x37   : > { %p482_p11 = pnand %p480_p9, %p451_p5  ;;  %p488_p10 = scmp.lt.u32.totalorder %s479_s4, %s742_s16 }
  0x38   : > { %p487_p4 = por %p486_p6, %p485_p3 }
  0x39   : > { %p483_p13 = pneg %p482_p11 }
  0x3a   : > { %p489_p12 = por %p488_p10, %p487_p4 }
  0x3c   : > { %p490_p1 = pnand %p489_p12, %p483_p13 }
  0x3e   : > { %493 = shalt.err (!%p490_p1)
}
  0x3f   : > { %s494_s25 = scalar_lea.vmem %s165_s19, 128  ;;  %s598_s26 = smov [#allocation5]  }
  0x40   : > { %p495_p2 = scmp.ne.s32.totalorder %s165_s19, %s494_s25  ;;  %s499_s3 = sshll.u32 %s598_s26, 4  ;;  %s500_s3 = int_to_ptr.vmem [resolvable:$false] %s499_s3 }
  0x41   : > { %s501_s8 = scalar_lea.vmem %s500_s3, 256  ;;  %p502_p8 = scmp.lt.s32.totalorder %s165_s19, %s500_s3 }
  0x42   : > { %p497_p9 = pnand %p495_p2, %p451_p5  ;;  %p503_p7 = scmp.lt.s32.totalorder %s501_s8, %s494_s25 }
  0x44   : > { %p498_p11 = pneg %p497_p9  ;;  %p504_p3 = por %p503_p7, %p502_p8 }
  0x46   : > { %p505_p6 = pnand %p504_p3, %p498_p11 }
  0x48   : > { %508 = shalt.err (!%p505_p6)
}
  0x49   : > { %389 = dma.hbm_to_vmem [thread:$0]  (!%p697_p0), %s742_s16, 128, %s165_s19, %s153_s30  }
  0x4a   : > { %p853_p13 = scmp.ne.s32.totalorder %s852_s7, 0 }
  0x4b   : > { %s769_s15 = sand.u32 (!%p853_p13), 1, %s579_s10   ;;  %p854_p8 = scmp.ne.s32.totalorder (!%p853_p13), %s846_s21, 0 }
  0x4c   : > { %173 = sbr.rel (%p853_p13) target bundleno = 136 (0x88), region = 28  ;;  %s772_s18 = sshll.u32 (!%p853_p13), %s769_s15, 3 }
  0x4d   : > { %s176_s4 = scalar_lea.sflag (!%p853_p13), [#allocation3], %s769_s15  ;;  %s179_s6 = scalar_lea.vmem (!%p853_p13), [#allocation2], %s772_s18 }
  0x53   : > { %562 = dma.done.wait (%p854_p8), %s176_s4, 128  }
  0x54   : > { %564 = vsyncadd (%p854_p8), %s176_s4, 4294967168  ;;  %s185_s5 = scalar_lea.sflag [#allocation6], %s769_s15  ;;  %s188_s7 = scalar_lea.vmem [#allocation5], %s772_s18 }
  0x55   : > { %566 = dma.done.wait (%p854_p8), %s185_s5, 128  }
  0x56   : > { %568 = vsyncadd (%p854_p8), %s185_s5, 4294967168  ;;  %v221_v0 = vld [vmem:[%s179_s6] sm:$0xff]  ;;  %v222_v7 = vld [vmem:[%s188_s7] sm:$0xff]  ;;  %s374_s21 = sshll.u32 %s587_s12, 7  ;;  %s213_s16 = scalar_lea.vmem [#allocation7], %s772_s18 }
  0x57   : > { %v226_v1 = vand.u32 2147483647, %v221_v0  ;;  %v223_v9 = vmax.f32 %v221_v0, 0.0  ;;  %v224_v10 = vmul.f32 %v222_v7, %v221_v0  ;;  %s258_s19 = sshll.u32 %s213_s16, 4  ;;  %s791_s27 = scalar_lea.hbm %s842_s2, %s374_s21  ;;  %s793_s19 = int_to_ptr.vmem [resolvable:$true] %s258_s19 }
  0x58   : > { %s245_s28 = scalar_lea.sflag [#allocation4], %s769_s15  ;;  %s509_s29 = scalar_lea.vmem %s793_s19, 128 }
  0x59   : > { %v227_v2 = vsub.f32 0.0, %v226_v1  ;;  %v225_v14 = vsub.f32 %v223_v9, %v224_v10  ;;  %p510_p0 = scmp.ne.s32.totalorder %s793_s19, %s509_s29  ;;  %p855_p5 = scmp.ne.s32.totalorder %s847_s22, 0 }
  0x5a   : > { %s599_s12 = smov [#allocation7]  }
  0x5b   : > { %v228_v3 = vmul.f32 1.442695, %v227_v2  ;;  %p511_p7 = pnand %p510_p0, %p855_p5  ;;  %s513_s25 = sshll.u32 %s599_s12, 4  ;;  %s514_s25 = int_to_ptr.vmem [resolvable:$false] %s513_s25 }
  0x5c   : > { %s515_s26 = scalar_lea.vmem %s514_s25, 256  ;;  %p516_p10 = scmp.lt.s32.totalorder %s793_s19, %s514_s25 }
  0x5d   : > { %445 = vpow2.f32 %v228_v3  ;;  %p512_p4 = pneg %p511_p7  ;;  %p517_p12 = scmp.lt.s32.totalorder %s515_s26, %s509_s29 }
  0x5f   : > { %p518_p1 = por %p517_p12, %p516_p10 }
  0x61   : > { %p519_p2 = pnand %p518_p1, %p512_p4 }
  0x67   : > { %v446_v4 = vpop.eup %445 }
  0x68   : > { %v230_v5 = vadd.f32 1.0, %v446_v4  ;;  %v233_v6 = vmul.f32 -0.5, %v446_v4  ;;  %v236_v11 = vand.u32 2147483647, %v446_v4 }
  0x6a   : > { %447 = vlog2.f32 %v230_v5  ;;  %v234_v8 = vadd.f32 1.0, %v233_v6  ;;  %vm237_vm0 = vcmp.lt.f32.partialorder %v236_v11, 0.0004427343 }
  0x6c   : > { %v235_v12 = vmul.f32 %v446_v4, %v234_v8 }
  0x74   : > { %v448_v13 = vpop.eup %447 }
  0x75   : > { %v232_v15 = vmul.f32 0.6931472, %v448_v13 }
  0x77   : > { %v238_v16 = vsel %vm237_vm0, %v235_v12, %v232_v15 }
  0x78   : > { %v239_v17 = vadd.f32 %v238_v16, %v225_v14 }
  0x7a   : > { %243 = vst [vmem:[%s213_s16] sm:$0xff] %v239_v17 }
  0x7b   : > { %522 = shalt.err (!%p519_p2)
}
  0x7c   : > { %s523_s3 = scalar_lea.hbm %s791_s27, 128  ;;  %s527_s18 = scalar_lea.hbm %s842_s2, 256 }
  0x7d   : > { %p524_p9 = scmp.ne.s32.totalorder %s791_s27, %s523_s3  ;;  %p528_p6 = scmp.lt.u32.totalorder %s791_s27, %s842_s2 }
  0x7e   : > { %p529_p13 = scmp.lt.u32.totalorder %s527_s18, %s523_s3  ;;  %p531_p0 = scmp.lt.u32.totalorder %s523_s3, %s791_s27 }
  0x7f   : > { %p525_p11 = pnand %p524_p9, %p855_p5 }
  0x80   : > { %p530_p8 = por %p529_p13, %p528_p6 }
  0x81   : > { %p526_p3 = pneg %p525_p11 }
  0x82   : > { %p532_p7 = por %p531_p0, %p530_p8 }
  0x84   : > { %p533_p4 = pnand %p532_p7, %p526_p3 }
  0x86   : > { %536 = shalt.err (!%p533_p4)
}
  0x87   : > { %381 = dma.vmem_to_hbm [thread:$0]  (%p855_p5), %s793_s19, 128, %s791_s27, %s245_s28  }
  0x88 PF: > { %s270_s5 = sand.u32 1, %s575_s9   ;;  %p856_p10 = scmp.ne.s32.totalorder %s848_s24, 0 }
  0x89   : > { %p857_p12 = scmp.ge.s32.totalorder %s595_s14, 2  ;;  %s271_s7 = scalar_lea.sflag [#allocation4], %s270_s5 }
  0x8b   : > { %p391_p1 = pnand %p857_p12, %p856_p10 }
  0x8d   : > { %570 = dma.done.wait (!%p391_p1), %s271_s7, 128  }
  0x8e   : > { %572 = vsyncadd (!%p391_p1), %s271_s7, 4294967168  ;;  %s21_s14 = sadd.s32 1, %s595_s14   ;;  %s858_s9 = smov %s579_s10 }
  0x8f   : > { %p18_p2 = scmp.ge.s32.totalorder %s21_s14, 4   ;;  %s859_s10 = smov %s583_s11 }
  0x90   : > { %s860_s11 = smov %s671_s23  ;;  %s861_s12 = smov %s591_s13 }
  0x91   : > { %s862_s13 = smov %s864_s17  ;;  %20 = sbr.rel (!%p18_p2) target bundleno = 8 (0x8), region = 90 }
  0x98   :  { %276 = vsyncpa [#allocation3], 1 }
  0x99   :  { %278 = vsyncpa [#allocation3 + $0x1], 1 }
  0x9a   :  { %279 = vsyncpa [#allocation6], 1 }
  0x9b   :  { %281 = vsyncpa [#allocation6 + $0x1], 1 }
  0x9c   :  { %282 = vsyncpa [#allocation4], 1 }
  0x9d   :  { %284 = vsyncpa [#allocation4 + $0x1], 1 }

</bundles_post_ra>
